<compile_context>
chip_gen: v7x
topology: tpu7x:2x2x1
jax: 0.10.0
libtpu: 0.0.40
codegen_flags: <defaults>
</compile_context>

<pallas_src>
import functools

import jax
import jax.numpy as jnp
import numpy as np
from jax import lax
from jax.experimental import pallas as pl
from jax.experimental.pallas import tpu as pltpu


def _round_up(x: int, m: int) -> int:
    return ((x + m - 1) // m) * m


def _next_pow2(n: int) -> int:
    return 1 if n <= 1 else 1 << (n - 1).bit_length()


def _bf16_native_vpu() -> bool:
    """bf16 compares are VPU-native on v6e / v7x; upcast on older gens."""
    try:
        kind = jax.devices()[0].device_kind.lower()
    except Exception:
        return False
    return ("v6" in kind) or ("v7" in kind) or ("7x" in kind)


def _band_argmax(band, sub_iota, lp: int, clamp_max: int):
    """First-occurrence argmax over axis 0 of band [lp, W] -> [1, W] int32."""
    mx = jnp.max(band, axis=0, keepdims=True)                      # [1, W]
    idx = jnp.min(jnp.where(band == mx, sub_iota, lp),
                  axis=0, keepdims=True)                           # [1, W]
    # TODO(synk): diverges from torch.argmax for NaN columns (torch returns the
    # NaN position); clamp keeps the index in range for the host label table.
    return jnp.minimum(idx, clamp_max)


def _greedy_ctc_kernel(x_ref, halo_ref, out_ref, *, blank: int, lp: int,
                       fold: int, clamp_max: int, compute_dtype):
    """One tile.

    x_ref:    [TR, width]  width = fold*lp; row r holds timesteps
              fold*(i*TR + r) + b for b in [0, fold), each as lp label logits.
    halo_ref: [8, width]   last 8 rows of the previous tile (same array),
              used only to recover the argmax of the timestep just before
              this tile (replaces the old sequential carry scratch).
    out_ref:  [fold, TR]   out[b, r] = argmax label at time fold*r + b if that
              timestep starts a new non-blank run, else -1.
    """
    i = pl.program_id(0)

    x = x_ref[...].astype(compute_dtype)                           # [TR, width]
    tr = x.shape[0]
    xt = jnp.transpose(x)                                          # [width, TR]

    # Per-band argmax over the lp label rows (temporaries are [lp, TR], i.e.
    # 1/fold of the tile, instead of a full-tile iota/where).
    sub_iota = lax.broadcasted_iota(jnp.int32, (lp, tr), 0)
    idxs = [_band_argmax(xt[b * lp:(b + 1) * lp, :], sub_iota, lp, clamp_max)
            for b in range(fold)]                                  # fold x [1, TR]

    # Argmax of the timestep immediately before this tile, recomputed from the
    # halo (band fold-1 of the halo's last row).  Sentinel -1 on tile 0 so the
    # very first timestep is always treated as "new" (kept iff non-blank).
    hrow = halo_ref[halo_ref.shape[0] - 1:halo_ref.shape[0], :].astype(
        compute_dtype)                                             # [1, width]
    width = hrow.shape[1]
    lane = lax.broadcasted_iota(jnp.int32, (1, width), 1)
    lo = (fold - 1) * lp
    in_band = jnp.logical_and(lane >= lo, lane < lo + lp)
    neg = jnp.asarray(-jnp.inf, compute_dtype)
    hm = jnp.max(jnp.where(in_band, hrow, neg), axis=1, keepdims=True)
    hidx = jnp.min(jnp.where(jnp.logical_and(in_band, hrow == hm),
                             lane - lo, lp), axis=1, keepdims=True)
    hidx = jnp.minimum(hidx, clamp_max)                            # [1, 1]
    carry = jnp.where(i == 0, jnp.full_like(hidx, -1), hidx)       # [1, 1]

    # unique_consecutive: keep time t iff idx[t] != idx[t-1].
    #   band b >= 1 at row r: previous timestep is band b-1, same row.
    #   band 0 at row r:      previous timestep is band fold-1, row r-1
    #                         (lane roll; lane 0 comes from the halo carry).
    pos = lax.broadcasted_iota(jnp.int32, (1, tr), 1)
    rolled = pltpu.roll(idxs[fold - 1], shift=1, axis=1)
    prev0 = jnp.where(pos == 0, carry, rolled)
    prevs = [prev0] + idxs[:-1]

    for b in range(fold):
        keep = jnp.logical_and(idxs[b] != prevs[b], idxs[b] != blank)
        out_ref[b:b + 1, :] = jnp.where(keep, idxs[b], -1)


def greedy_ctc_packed(emission: jax.Array, *, blank: int = 0,
                      block_t: int = 32768) -> jax.Array:
    """Pallas device pass.

    Returns a [fold, R] int32 array; entry [b, r] is the argmax label index at
    timestep fold*r + b when that timestep starts a new non-blank run, and -1
    otherwise.  Entries with fold*r + b >= T are padding.
    """
    T, L = emission.shape

    # Label axis is folded into the 128-lane dim: lp = padded label count,
    # fold = timesteps per 128-wide row.
    if L <= 128:
        lp = max(8, _next_pow2(L))
        fold = 128 // lp
    else:
        lp = _round_up(L, 128)
        fold = 1
    width = lp * fold

    compute_dtype = (jnp.bfloat16
                     if (emission.dtype == jnp.bfloat16 and _bf16_native_vpu())
                     else jnp.float32)

    x = emission
    if lp != L:
        # TODO(synk): label-dim pad is one extra HBM pass; only hit when the
        # label count is not already a power-of-two divisor of 128.
        x = jnp.pad(x, ((0, 0), (0, lp - L)), constant_values=-np.inf)

    # Time tiling: TR rows per tile (fold*TR timesteps).  TR is always a
    # multiple of 128 so every in-kernel minor dim is lane-dense.
    tr_max = max(128, (max(block_t, fold) // fold) // 128 * 128)
    r0 = _round_up(T, fold) // fold
    if r0 <= tr_max:
        # Single tile: round the (small) input up so TR is a 128 multiple.
        t_pad = _round_up(T, fold * 128)
        tr = t_pad // fold
    else:
        # Multi-tile (the performance-relevant case): pad only to `fold`.
        # TODO(synk): a copy is unavoidable when T % fold != 0 (the free
        # reshape to a 128-wide lane layout needs T*L % 128 == 0).
        t_pad = _round_up(T, fold)
        tr = tr_max
    if t_pad != T:
        x = jnp.pad(x, ((0, t_pad - T), (0, 0)))

    r_total = t_pad // fold
    x2 = x.reshape(r_total, width)          # layout-preserving view, no HBM pass
    grid = pl.cdiv(r_total, tr)
    hb = 8                                  # halo rows (>= 1 previous timestep)

    kernel = functools.partial(_greedy_ctc_kernel, blank=blank, lp=lp,
                               fold=fold, clamp_max=L - 1,
                               compute_dtype=compute_dtype)
    itemsize = jnp.dtype(x2.dtype).itemsize
    return pl.pallas_call(
        kernel,
        out_shape=jax.ShapeDtypeStruct((fold, grid * tr), jnp.int32),
        grid=(grid,),
        in_specs=[
            pl.BlockSpec((tr, width), lambda i: (i, 0)),
            # Halo: last 8 rows of the previous tile (same array, re-read).
            pl.BlockSpec((hb, width),
                         lambda i: (jnp.maximum(i * (tr // 8) - 1, 0), 0)),
        ],
        out_specs=pl.BlockSpec((fold, tr), lambda i: (0, i)),
        compiler_params=pltpu.CompilerParams(
            # Halo read (not a carry) -> tiles are independent; v7x megacore
            # can split the time axis across both TensorCores.
            dimension_semantics=("parallel",),
            vmem_limit_bytes=32 * 1024 * 1024,
        ),
        cost_estimate=pl.CostEstimate(
            flops=3 * r_total * width,
            transcendentals=0,
            bytes_accessed=r_total * width * itemsize
            + grid * hb * width * itemsize
            + fold * grid * tr * 4),
    )(x2, x2)


def greedy_ctc_decode(emission: jax.Array, labels, *, blank: int = 0,
                      block_t: int = 32768) -> str:
    """Pallas-accelerated equivalent of GreedyCTCDecoder.forward."""
    T = emission.shape[0]
    packed = greedy_ctc_packed(emission, blank=blank, block_t=block_t)
    # TODO(synk): variable-length compaction + label string join has no Pallas
    # equivalent (ragged output / Python str); done host-side below.
    arr = np.asarray(packed)                 # syncs; [fold, R]
    seq = arr.T.reshape(-1)[:T]              # time order: t = fold*r + b
    kept = seq[seq >= 0]
    return "".join(labels[int(i)] for i in kept)


def _reference_decode(emission_np: np.ndarray, labels, blank: int = 0) -> str:
    indices = np.argmax(emission_np.astype(np.float32), axis=-1)
    out, prev = [], None
    for i in indices:
        if prev is None or i != prev:
            if i != blank:
                out.append(labels[int(i)])
        prev = i
    return "".join(out)


def _make_emission(key, pattern: np.ndarray, num_labels: int,
                   dtype=jnp.float32) -> jax.Array:
    t = pattern.shape[0]
    noise = jax.random.normal(key, (t, num_labels), jnp.float32) * 0.1
    boost = jax.nn.one_hot(jnp.asarray(pattern), num_labels,
                           dtype=jnp.float32) * 5.0
    return (noise + boost).astype(dtype)


if __name__ == "__main__":
    # 32 labels: blank '-' at index 0, then 31 more symbols (wav2vec2 style).
    labels = tuple("-abcdefghijklmnopqrstuvwxyz |'._")
    assert len(labels) == 32
    L = len(labels)
    key = jax.random.PRNGKey(0)
    k1, k2 = jax.random.split(key)

    # Small test: repeats + blanks exercise unique_consecutive / blank drop,
    # and T=50 exercises the padded (T % 4 != 0) single-tile path.
    proto = [8, 8, 0, 5, 5, 5, 0, 0, 12, 1, 1, 0, 3]
    T1 = 50
    pat1 = np.array((proto * (T1 // len(proto) + 1))[:T1], dtype=np.int32)
    em1 = _make_emission(k1, pat1, L, jnp.float32)

    packed = greedy_ctc_packed(em1)
    jax.block_until_ready(packed)

    got1 = greedy_ctc_decode(em1, labels)
    want1 = _reference_decode(np.asarray(em1), labels)
    assert got1 == want1, f"f32 mismatch: {got1!r} vs {want1!r}"

    # bf16 emission path (native bf16 compares on v6e/v7x, upcast elsewhere).
    em1_bf16 = em1.astype(jnp.bfloat16)
    got1b = greedy_ctc_decode(em1_bf16, labels)
    want1b = _reference_decode(np.asarray(em1_bf16.astype(jnp.float32)), labels)
    assert got1b == want1b, f"bf16 mismatch: {got1b!r} vs {want1b!r}"

    # Multi-tile test (block_t=512 -> tr=128 rows -> 3 tiles): same-label runs
    # spanning the time-512 and time-1024 tile boundaries exercise the halo
    # read that replaced the sequential carry; T % 4 == 0 so no pad/copy.
    T2 = 1500
    pat2 = np.array((proto * (T2 // len(proto) + 1))[:T2], dtype=np.int32)
    pat2[500:520] = 7      # non-blank run crossing the first tile boundary
    pat2[700:710] = 0      # blank run inside a tile
    pat2[1016:1032] = 9    # non-blank run crossing the second tile boundary
    em2 = _make_emission(k2, pat2, L, jnp.float32)
    got2 = greedy_ctc_decode(em2, labels, block_t=512)
    want2 = _reference_decode(np.asarray(em2), labels)
    assert got2 == want2, f"multi-tile mismatch: {got2!r} vs {want2!r}"

    # Same input through the default large-tile (single-tile) path.
    got2b = greedy_ctc_decode(em2, labels)
    assert got2b == want2, f"large-tile mismatch: {got2b!r} vs {want2}"

    print("KERNEL_OK")
</pallas_src>

<mosaic_0001>
module attributes {stable_mosaic.version = 11 : i64} {
  func.func @_greedy_ctc_kernel(%arg0: i32, %arg1: memref<128x128xf32, #tpu.memory_space<vmem>>, %arg2: memref<8x128xf32, #tpu.memory_space<vmem>>, %arg3: memref<4x128xi32, #tpu.memory_space<vmem>>) attributes {dimension_semantics = [#tpu.dimension_semantics<parallel>], iteration_bounds = array<i64: 1>, scalar_prefetch = 0 : i64, scratch_operands = 0 : i64, tpu.core_type = #tpu.core_type<tc>, window_params = [{transform_indices = @transform_0, window_bounds = array<i64: 128, 128>}, {transform_indices = @transform_1, window_bounds = array<i64: 8, 128>}, {transform_indices = @transform_2, window_bounds = array<i64: 4, 128>}]} {
    %c0 = arith.constant 0 : index
    %c0_0 = arith.constant 0 : index
    %0 = vector.load %arg1[%c0, %c0_0] : memref<128x128xf32, #tpu.memory_space<vmem>>, vector<128x128xf32>
    %1 = tpu.transpose %0, [1, 0] : vector<128x128xf32> -> vector<128x128xf32>
    %2 = tpu.iota {dimensions = array<i32: 0>} : vector<32x128xi32>
    %3 = vector.extract_strided_slice %1 {offsets = [0, 0], sizes = [32, 128], strides = [1, 1]} : vector<128x128xf32> to vector<32x128xf32>
    %cst = arith.constant dense<0xFF800000> : vector<128xf32>
    %4 = vector.multi_reduction <maximumf>, %3, %cst [0] : vector<32x128xf32> to vector<128xf32>
    %5 = vector.shape_cast %4 : vector<128xf32> to vector<1x128xf32>
    %6 = vector.broadcast %5 : vector<1x128xf32> to vector<32x128xf32>
    %7 = arith.cmpf oeq, %3, %6 : vector<32x128xf32>
    %c32_i32 = arith.constant 32 : i32
    %8 = vector.broadcast %c32_i32 : i32 to vector<32x128xi32>
    %9 = arith.select %7, %2, %8 : vector<32x128xi1>, vector<32x128xi32>
    %cst_1 = arith.constant dense<2147483647> : vector<128xi32>
    %10 = vector.multi_reduction <minsi>, %9, %cst_1 [0] : vector<32x128xi32> to vector<128xi32>
    %11 = vector.shape_cast %10 : vector<128xi32> to vector<1x128xi32>
    %c31_i32 = arith.constant 31 : i32
    %12 = vector.broadcast %c31_i32 : i32 to vector<1x128xi32>
    %13 = arith.minsi %11, %12 : vector<1x128xi32>
    %14 = vector.extract_strided_slice %1 {offsets = [32, 0], sizes = [32, 128], strides = [1, 1]} : vector<128x128xf32> to vector<32x128xf32>
    %cst_2 = arith.constant dense<0xFF800000> : vector<128xf32>
    %15 = vector.multi_reduction <maximumf>, %14, %cst_2 [0] : vector<32x128xf32> to vector<128xf32>
    %16 = vector.shape_cast %15 : vector<128xf32> to vector<1x128xf32>
    %17 = vector.broadcast %16 : vector<1x128xf32> to vector<32x128xf32>
    %18 = arith.cmpf oeq, %14, %17 : vector<32x128xf32>
    %c32_i32_3 = arith.constant 32 : i32
    %19 = vector.broadcast %c32_i32_3 : i32 to vector<32x128xi32>
    %20 = arith.select %18, %2, %19 : vector<32x128xi1>, vector<32x128xi32>
    %cst_4 = arith.constant dense<2147483647> : vector<128xi32>
    %21 = vector.multi_reduction <minsi>, %20, %cst_4 [0] : vector<32x128xi32> to vector<128xi32>
    %22 = vector.shape_cast %21 : vector<128xi32> to vector<1x128xi32>
    %c31_i32_5 = arith.constant 31 : i32
    %23 = vector.broadcast %c31_i32_5 : i32 to vector<1x128xi32>
    %24 = arith.minsi %22, %23 : vector<1x128xi32>
    %25 = vector.extract_strided_slice %1 {offsets = [64, 0], sizes = [32, 128], strides = [1, 1]} : vector<128x128xf32> to vector<32x128xf32>
    %cst_6 = arith.constant dense<0xFF800000> : vector<128xf32>
    %26 = vector.multi_reduction <maximumf>, %25, %cst_6 [0] : vector<32x128xf32> to vector<128xf32>
    %27 = vector.shape_cast %26 : vector<128xf32> to vector<1x128xf32>
    %28 = vector.broadcast %27 : vector<1x128xf32> to vector<32x128xf32>
    %29 = arith.cmpf oeq, %25, %28 : vector<32x128xf32>
    %c32_i32_7 = arith.constant 32 : i32
    %30 = vector.broadcast %c32_i32_7 : i32 to vector<32x128xi32>
    %31 = arith.select %29, %2, %30 : vector<32x128xi1>, vector<32x128xi32>
    %cst_8 = arith.constant dense<2147483647> : vector<128xi32>
    %32 = vector.multi_reduction <minsi>, %31, %cst_8 [0] : vector<32x128xi32> to vector<128xi32>
    %33 = vector.shape_cast %32 : vector<128xi32> to vector<1x128xi32>
    %c31_i32_9 = arith.constant 31 : i32
    %34 = vector.broadcast %c31_i32_9 : i32 to vector<1x128xi32>
    %35 = arith.minsi %33, %34 : vector<1x128xi32>
    %36 = vector.extract_strided_slice %1 {offsets = [96, 0], sizes = [32, 128], strides = [1, 1]} : vector<128x128xf32> to vector<32x128xf32>
    %cst_10 = arith.constant dense<0xFF800000> : vector<128xf32>
    %37 = vector.multi_reduction <maximumf>, %36, %cst_10 [0] : vector<32x128xf32> to vector<128xf32>
    %38 = vector.shape_cast %37 : vector<128xf32> to vector<1x128xf32>
    %39 = vector.broadcast %38 : vector<1x128xf32> to vector<32x128xf32>
    %40 = arith.cmpf oeq, %36, %39 : vector<32x128xf32>
    %c32_i32_11 = arith.constant 32 : i32
    %41 = vector.broadcast %c32_i32_11 : i32 to vector<32x128xi32>
    %42 = arith.select %40, %2, %41 : vector<32x128xi1>, vector<32x128xi32>
    %cst_12 = arith.constant dense<2147483647> : vector<128xi32>
    %43 = vector.multi_reduction <minsi>, %42, %cst_12 [0] : vector<32x128xi32> to vector<128xi32>
    %44 = vector.shape_cast %43 : vector<128xi32> to vector<1x128xi32>
    %c31_i32_13 = arith.constant 31 : i32
    %45 = vector.broadcast %c31_i32_13 : i32 to vector<1x128xi32>
    %46 = arith.minsi %44, %45 : vector<1x128xi32>
    %c7 = arith.constant 7 : index
    %c0_14 = arith.constant 0 : index
    %47 = vector.load %arg2[%c7, %c0_14] : memref<8x128xf32, #tpu.memory_space<vmem>>, vector<1x128xf32>
    %48 = tpu.iota {dimensions = array<i32: 1>} : vector<1x128xi32>
    %c96_i32 = arith.constant 96 : i32
    %49 = vector.broadcast %c96_i32 : i32 to vector<1x128xi32>
    %50 = arith.cmpi sge, %48, %49 : vector<1x128xi32>
    %c128_i32 = arith.constant 128 : i32
    %51 = vector.broadcast %c128_i32 : i32 to vector<1x128xi32>
    %52 = arith.cmpi slt, %48, %51 : vector<1x128xi32>
    %53 = arith.andi %50, %52 : vector<1x128xi1>
    %cst_15 = arith.constant 0xFF800000 : f32
    %54 = vector.broadcast %cst_15 : f32 to vector<1x128xf32>
    %55 = arith.select %53, %47, %54 : vector<1x128xi1>, vector<1x128xf32>
    %cst_16 = arith.constant dense<0xFF800000> : vector<1xf32>
    %56 = vector.multi_reduction <maximumf>, %55, %cst_16 [1] : vector<1x128xf32> to vector<1xf32>
    %57 = vector.shape_cast %56 : vector<1xf32> to vector<1x1xf32>
    %58 = vector.broadcast %57 : vector<1x1xf32> to vector<1x128xf32>
    %59 = arith.cmpf oeq, %47, %58 : vector<1x128xf32>
    %60 = arith.andi %53, %59 : vector<1x128xi1>
    %c96_i32_17 = arith.constant 96 : i32
    %61 = vector.broadcast %c96_i32_17 : i32 to vector<1x128xi32>
    %62 = arith.subi %48, %61 : vector<1x128xi32>
    %c32_i32_18 = arith.constant 32 : i32
    %63 = vector.broadcast %c32_i32_18 : i32 to vector<1x128xi32>
    %64 = arith.select %60, %62, %63 : vector<1x128xi1>, vector<1x128xi32>
    %cst_19 = arith.constant dense<2147483647> : vector<1xi32>
    %65 = vector.multi_reduction <minsi>, %64, %cst_19 [1] : vector<1x128xi32> to vector<1xi32>
    %66 = vector.shape_cast %65 : vector<1xi32> to vector<1x1xi32>
    %c31_i32_20 = arith.constant 31 : i32
    %67 = vector.broadcast %c31_i32_20 : i32 to vector<1x1xi32>
    %68 = arith.minsi %66, %67 : vector<1x1xi32>
    %c0_i32 = arith.constant 0 : i32
    %69 = arith.cmpi eq, %arg0, %c0_i32 : i32
    %c-1_i32 = arith.constant -1 : i32
    %70 = vector.broadcast %c-1_i32 : i32 to vector<1x1xi32>
    %71 = arith.select %69, %70, %68 : vector<1x1xi32>
    %72 = tpu.iota {dimensions = array<i32: 1>} : vector<1x128xi32>
    %c1_i32 = arith.constant 1 : i32
    %73 = tpu.dynamic_rotate %46 by %c1_i32 dim 1 : vector<1x128xi32>, i32 -> vector<1x128xi32>
    %c0_i32_21 = arith.constant 0 : i32
    %74 = vector.broadcast %c0_i32_21 : i32 to vector<1x128xi32>
    %75 = arith.cmpi eq, %72, %74 : vector<1x128xi32>
    %76 = vector.shape_cast %71 : vector<1x1xi32> to vector<1x1xi32>
    %77 = vector.broadcast %76 : vector<1x1xi32> to vector<1x128xi32>
    %78 = arith.select %75, %77, %73 : vector<1x128xi1>, vector<1x128xi32>
    %79 = arith.cmpi ne, %13, %78 : vector<1x128xi32>
    %c0_i32_22 = arith.constant 0 : i32
    %80 = vector.broadcast %c0_i32_22 : i32 to vector<1x128xi32>
    %81 = arith.cmpi ne, %13, %80 : vector<1x128xi32>
    %82 = arith.andi %79, %81 : vector<1x128xi1>
    %c-1_i32_23 = arith.constant -1 : i32
    %83 = vector.broadcast %c-1_i32_23 : i32 to vector<1x128xi32>
    %84 = arith.select %82, %13, %83 : vector<1x128xi1>, vector<1x128xi32>
    %c0_24 = arith.constant 0 : index
    %c0_25 = arith.constant 0 : index
    %85 = vector.load %arg3[%c0_24, %c0_25] : memref<4x128xi32, #tpu.memory_space<vmem>>, vector<1x128xi32>
    tpu.vector_store %arg3[%c0_24, %c0_25], %84 {strides = array<i32>} : memref<4x128xi32, #tpu.memory_space<vmem>>, vector<1x128xi32>,
    %86 = arith.cmpi ne, %24, %13 : vector<1x128xi32>
    %c0_i32_26 = arith.constant 0 : i32
    %87 = vector.broadcast %c0_i32_26 : i32 to vector<1x128xi32>
    %88 = arith.cmpi ne, %24, %87 : vector<1x128xi32>
    %89 = arith.andi %86, %88 : vector<1x128xi1>
    %c-1_i32_27 = arith.constant -1 : i32
    %90 = vector.broadcast %c-1_i32_27 : i32 to vector<1x128xi32>
    %91 = arith.select %89, %24, %90 : vector<1x128xi1>, vector<1x128xi32>
    %c1 = arith.constant 1 : index
    %c0_28 = arith.constant 0 : index
    %92 = vector.load %arg3[%c1, %c0_28] : memref<4x128xi32, #tpu.memory_space<vmem>>, vector<1x128xi32>
    tpu.vector_store %arg3[%c1, %c0_28], %91 {strides = array<i32>} : memref<4x128xi32, #tpu.memory_space<vmem>>, vector<1x128xi32>,
    %93 = arith.cmpi ne, %35, %24 : vector<1x128xi32>
    %c0_i32_29 = arith.constant 0 : i32
    %94 = vector.broadcast %c0_i32_29 : i32 to vector<1x128xi32>
    %95 = arith.cmpi ne, %35, %94 : vector<1x128xi32>
    %96 = arith.andi %93, %95 : vector<1x128xi1>
    %c-1_i32_30 = arith.constant -1 : i32
    %97 = vector.broadcast %c-1_i32_30 : i32 to vector<1x128xi32>
    %98 = arith.select %96, %35, %97 : vector<1x128xi1>, vector<1x128xi32>
    %c2 = arith.constant 2 : index
    %c0_31 = arith.constant 0 : index
    %99 = vector.load %arg3[%c2, %c0_31] : memref<4x128xi32, #tpu.memory_space<vmem>>, vector<1x128xi32>
    tpu.vector_store %arg3[%c2, %c0_31], %98 {strides = array<i32>} : memref<4x128xi32, #tpu.memory_space<vmem>>, vector<1x128xi32>,
    %100 = arith.cmpi ne, %46, %35 : vector<1x128xi32>
    %c0_i32_32 = arith.constant 0 : i32
    %101 = vector.broadcast %c0_i32_32 : i32 to vector<1x128xi32>
    %102 = arith.cmpi ne, %46, %101 : vector<1x128xi32>
    %103 = arith.andi %100, %102 : vector<1x128xi1>
    %c-1_i32_33 = arith.constant -1 : i32
    %104 = vector.broadcast %c-1_i32_33 : i32 to vector<1x128xi32>
    %105 = arith.select %103, %46, %104 : vector<1x128xi1>, vector<1x128xi32>
    %c3 = arith.constant 3 : index
    %c0_34 = arith.constant 0 : index
    %106 = vector.load %arg3[%c3, %c0_34] : memref<4x128xi32, #tpu.memory_space<vmem>>, vector<1x128xi32>
    tpu.vector_store %arg3[%c3, %c0_34], %105 {strides = array<i32>} : memref<4x128xi32, #tpu.memory_space<vmem>>, vector<1x128xi32>,
    return
  }
  func.func @transform_0(%arg0: i32) -> (i32, i32) {
    %c0_i32 = arith.constant 0 : i32
    %c0_i32_0 = arith.constant 0 : i32
    return %arg0, %c0_i32 : i32, i32
  }
  func.func @transform_1(%arg0: i32) -> (i32, i32) {
    %c16_i32 = arith.constant 16 : i32
    %0 = arith.muli %arg0, %c16_i32 : i32
    %c1_i32 = arith.constant 1 : i32
    %1 = arith.subi %0, %c1_i32 : i32
    %c0_i32 = arith.constant 0 : i32
    %2 = arith.maxsi %1, %c0_i32 : i32
    %c0_i32_0 = arith.constant 0 : i32
    %c0_i32_1 = arith.constant 0 : i32
    return %2, %c0_i32_0 : i32, i32
  }
  func.func @transform_2(%arg0: i32) -> (i32, i32) {
    %c0_i32 = arith.constant 0 : i32
    %c0_i32_0 = arith.constant 0 : i32
    return %c0_i32, %arg0 : i32, i32
  }
}

</mosaic_0001>

<bundles_post_ra>
// kernel: tpu_custom_call.1
= control target key start
LH: loop header
LB: loop body
LE: loop exit
PB: predicated region body
PF: predicated region fallthrough
CT: control target
= control target key end

     0   :  { %7 = vsyncpa [#allocation3], 0  ;;  %s503_s0 = inlined_call_operand.hbm [shape: f32[128,128], index: 0, kind: input, shape index: {}]   ;;  %s504_s1 = inlined_call_operand.hbm [shape: f32[128,128], index: 1, kind: input, shape index: {}]   ;;  %s505_s2 = inlined_call_operand.hbm [shape: s32[4,128], index: 2, kind: output, shape index: {}]  }
   0x1   :  { %8 = vsyncpa [#allocation6], 0 }
   0x2   :  { %9 = vsyncpa [#allocation4], 0  ;;  %s395_s9 = smov [#allocation2]   ;;  %s323_s13 = scalar_lea.hbm %s503_s0, 2048 }
   0x3   :  { %s15_s10 = sshll.u32 %s395_s9, 4  ;;  %p324_p0 = scmp.ne.s32.totalorder %s503_s0, %s323_s13  ;;  %s16_s10 = int_to_ptr.vmem [resolvable:$true] %s15_s10 }
   0x4   :  { %p327_p1 = scmp.lt.u32.totalorder %s323_s13, %s503_s0 }
   0x6   :  { %p329_p2 = pnand %p327_p1, %p324_p0 }
   0x8   :  { %332 = shalt.err (!%p329_p2)
}
   0x9   :  { %s333_s18 = scalar_lea.vmem %s16_s10, 2048  ;;  %p338_p4 = scmp.lt.s32.totalorder %s16_s10, %s16_s10 }
   0xa   :  { %p334_p3 = scmp.ne.s32.totalorder %s16_s10, %s333_s18  ;;  %p339_p5 = scmp.lt.s32.totalorder %s333_s18, %s333_s18 }
   0xc   :  { %p340_p6 = por %p339_p5, %p338_p4 }
   0xe   :  { %p341_p7 = pnand %p340_p6, %p334_p3 }
  0x10   :  { %344 = shalt.err (!%p341_p7)
}
  0x11   :  { %s396_s19 = smov 128   ;;  %s397_s20 = smov 8  }
  0x12   :  { %21 = dma.hbm_to_vmem [thread:$0]  %s503_s0, 2048, %s16_s10, [#allocation3], %s396_s19, %s396_s19, %s397_s20  }
  0x13   :  { %s398_s23 = smov [#allocation5]   ;;  %s345_s27 = scalar_lea.hbm %s504_s1, 128 }
  0x14   :  { %s34_s24 = sshll.u32 %s398_s23, 4  ;;  %p346_p8 = scmp.ne.s32.totalorder %s504_s1, %s345_s27  ;;  %s35_s24 = int_to_ptr.vmem [resolvable:$true] %s34_s24 }
  0x15   :  { %s347_s4 = scalar_lea.hbm %s504_s1, 2048  ;;  %p349_p10 = scmp.lt.u32.totalorder %s345_s27, %s504_s1 }
  0x16   :  { %p348_p9 = scmp.lt.u32.totalorder %s347_s4, %s345_s27 }
  0x18   :  { %p350_p11 = por %p349_p10, %p348_p9 }
  0x1a   :  { %p351_p12 = pnand %p350_p11, %p346_p8 }
  0x1c   :  { %354 = shalt.err (!%p351_p12)
}
  0x1d   :  { %s355_s0 = scalar_lea.vmem %s35_s24, 128  ;;  %p360_p0 = scmp.lt.s32.totalorder %s35_s24, %s35_s24 }
  0x1e   :  { %p356_p13 = scmp.ne.s32.totalorder %s35_s24, %s355_s0  ;;  %p361_p1 = scmp.lt.s32.totalorder %s355_s0, %s355_s0 }
  0x20   :  { %p362_p2 = por %p361_p1, %p360_p0 }
  0x22   :  { %p363_p3 = pnand %p362_p2, %p356_p13 }
  0x24   :  { %366 = shalt.err (!%p363_p3)
}
  0x25   :  { %37 = dma.hbm_to_vmem [thread:$0]  %s504_s1, 128, %s35_s24, [#allocation6]  }
  0x26   :  { %389 = dma.done.wait [#allocation3], 2048  }
  0x27   :  { %390 = vsyncadd [#allocation3], 4294965248 }
  0x28   :  { %391 = dma.done.wait [#allocation6], 128  }
  0x29   :  { %392 = vsyncadd [#allocation6], 4294967168  ;;  %v48_v0 = vld [vmem:[#allocation2] sm:$0xff]  ;;  %v49_v1 = vld [vmem:[#allocation2 + $0x8] sm:$0xff]  ;;  %v96_v25 = vlaneseq  ;;  %s399_s1 = smov 1   ;;  %s400_s9 = smov [#allocation7]  }
  0x2a   :  { %64 = vxpose.xlu0.b32.start [1/16] %v48_v0, 128  ;;  %v50_v2 = vld [vmem:[#allocation2 + $0x10] sm:$0xff]  ;;  %v51_v3 = vld [vmem:[#allocation2 + $0x18] sm:$0xff]  ;;  %v52_v4 = vld [vmem:[#allocation2 + $0x20] sm:$0xff]  ;;  %s304_s10 = sshll.u32 %s400_s9, 4  ;;  %s305_s10 = int_to_ptr.vmem [resolvable:$true] %s304_s10 }
  0x2b   :  { %v53_v5 = vld [vmem:[#allocation2 + $0x28] sm:$0xff]  ;;  %v54_v6 = vld [vmem:[#allocation2 + $0x30] sm:$0xff]  ;;  %v55_v7 = vld [vmem:[#allocation2 + $0x38] sm:$0xff]  ;;  %v444_v29 = vshrl.u32 %v96_v25, 7  ;;  %s367_s11 = scalar_lea.vmem %s305_s10, 64  ;;  %p372_p5 = scmp.lt.s32.totalorder %s305_s10, %s305_s10 }
  0x2c   :  { %v56_v8 = vld [vmem:[#allocation2 + $0x40] sm:$0xff]  ;;  %v57_v9 = vld [vmem:[#allocation2 + $0x48] sm:$0xff]  ;;  %v58_v10 = vld [vmem:[#allocation2 + $0x50] sm:$0xff]  ;;  %p368_p4 = scmp.ne.s32.totalorder %s305_s10, %s367_s11  ;;  %p373_p6 = scmp.lt.s32.totalorder %s367_s11, %s367_s11 }
  0x2d   :  { %v59_v11 = vld [vmem:[#allocation2 + $0x58] sm:$0xff]  ;;  %v60_v12 = vld [vmem:[#allocation2 + $0x60] sm:$0xff]  ;;  %v61_v13 = vld [vmem:[#allocation2 + $0x68] sm:$0xff]  ;;  %v447_v33 = vadd.s32 8, %v444_v29  ;;  %v450_v34 = vadd.s32 16, %v444_v29  ;;  %v453_v35 = vadd.s32 24, %v444_v29 }
  0x2e   :  { %65 = vxpose.xlu0.b32.cont [2/16] %v49_v1, 128  ;;  %v62_v14 = vld [vmem:[#allocation2 + $0x70] sm:$0xff]  ;;  %v63_v15 = vld [vmem:[#allocation2 + $0x78] sm:$0xff]  ;;  %p374_p7 = por %p373_p6, %p372_p5 }
  0x30   :  { %p375_p8 = pnand %p374_p7, %p368_p4 }
  0x32   :  { %66 = vxpose.xlu0.b32.cont [3/16] %v50_v2, 128 }
  0x36   :  { %67 = vxpose.xlu0.b32.cont [4/16] %v51_v3, 128 }
  0x3a   :  { %68 = vxpose.xlu0.b32.cont [5/16] %v52_v4, 128 }
  0x3e   :  { %69 = vxpose.xlu0.b32.cont [6/16] %v53_v5, 128 }
  0x42   :  { %70 = vxpose.xlu0.b32.cont [7/16] %v54_v6, 128 }
  0x46   :  { %71 = vxpose.xlu0.b32.cont [8/16] %v55_v7, 128 }
  0x4a   :  { %72 = vxpose.xlu0.b32.cont [9/16] %v56_v8, 128 }
  0x4e   :  { %73 = vxpose.xlu0.b32.cont [10/16] %v57_v9, 128 }
  0x52   :  { %74 = vxpose.xlu0.b32.cont [11/16] %v58_v10, 128 }
  0x56   :  { %75 = vxpose.xlu0.b32.cont [12/16] %v59_v11, 128 }
  0x5a   :  { %76 = vxpose.xlu0.b32.cont [13/16] %v60_v12, 128 }
  0x5e   :  { %77 = vxpose.xlu0.b32.cont [14/16] %v61_v13, 128 }
  0x62   :  { %78 = vxpose.xlu0.b32.cont [15/16] %v62_v14, 128 }
  0x66   :  { %79 = vxpose.xlu0.b32.end [16/16] %v63_v15, 128 }
  0xaa   :  { %v80_v16 = vpop.trf.xlu0 }
  0xae   :  { %v81_v17 = vpop.trf.xlu0 }
  0xaf   :  { %v101_v20 = vmax.f32 %v80_v16, %v81_v17 }
  0xb2   :  { %v82_v18 = vpop.trf.xlu0 }
  0xb6   :  { %v83_v19 = vpop.trf.xlu0 }
  0xb7   :  { %v102_v21 = vmax.f32 %v82_v18, %v83_v19 }
  0xb9   :  { %v103_v22 = vmax.f32 %v101_v20, %v102_v21 }
  0xba   :  { %v84_v23 = vpop.trf.xlu0 }
  0xbb   :  { %v104_v24 = vrot.slane %v103_v22, 4 }
  0xbd   :  { %v105_v26 = vmax.f32 %v103_v22, %v104_v24 }
  0xbe   :  { %v85_v27 = vpop.trf.xlu0 }
  0xbf   :  { %v106_v28 = vrot.slane %v105_v26, 2  ;;  %v135_v42 = vmax.f32 %v84_v23, %v85_v27 }
  0xc1   :  { %v107_v30 = vmax.f32 %v105_v26, %v106_v28 }
  0xc2   :  { %v86_v31 = vpop.trf.xlu0 }
  0xc3   :  { %v108_v32 = vrot.slane %v107_v30, 1 }
  0xc5   :  { %v109_v36 = vmax.f32 %v107_v30, %v108_v32 }
  0xc6   :  { %v87_v37 = vpop.trf.xlu0 }
  0xc7   :  { %vm110_vm0 = vcmp.eq.f32.partialorder %v80_v16, %v109_v36  ;;  %vm111_vm1 = vcmp.eq.f32.partialorder %v81_v17, %v109_v36  ;;  %vm112_vm2 = vcmp.eq.f32.partialorder %v82_v18, %v109_v36  ;;  %vm113_vm3 = vcmp.eq.f32.partialorder %v83_v19, %v109_v36 }
  0xc8   :  { %v114_v38 = vsel %vm110_vm0, %v444_v29, 32  ;;  %v115_v39 = vsel %vm111_vm1, %v447_v33, 32  ;;  %v116_v40 = vsel %vm112_vm2, %v450_v34, 32  ;;  %v117_v41 = vsel %vm113_vm3, %v453_v35, 32 }
  0xc9   :  { %vm118_vm4 = vcmp.lt.s32.totalorder %v114_v38, %v115_v39  ;;  %vm120_vm5 = vcmp.lt.s32.totalorder %v116_v40, %v117_v41  ;;  %v136_v43 = vmax.f32 %v86_v31, %v87_v37 }
  0xca   :  { %v119_v44 = vsel %vm118_vm4, %v114_v38, %v115_v39  ;;  %v121_v45 = vsel %vm120_vm5, %v116_v40, %v117_v41  ;;  %v459_v46 = vpop.trf.xlu0 }
  0xcb   :  { %vm122_vm6 = vcmp.lt.s32.totalorder %v119_v44, %v121_v45  ;;  %v137_v47 = vmax.f32 %v135_v42, %v136_v43 }
  0xcc   :  { %v123_v48 = vsel %vm122_vm6, %v119_v44, %v121_v45 }
  0xcd   :  { %v124_v49 = vrot.slane %v123_v48, 4  ;;  %v138_v50 = vrot.slane %v137_v47, 4 }
  0xce   :  { %v89_v51 = vpop.trf.xlu0 }
  0xcf   :  { %vm125_vm7 = vcmp.lt.s32.totalorder %v123_v48, %v124_v49  ;;  %v139_v52 = vmax.f32 %v137_v47, %v138_v50  ;;  %v169_v62 = vmax.f32 %v459_v46, %v89_v51 }
  0xd0   :  { %v126_v53 = vsel %vm125_vm7, %v123_v48, %v124_v49 }
  0xd1   :  { %v140_v54 = vrot.slane %v139_v52, 2  ;;  %v127_v57 = vrot.slane %v126_v53, 2 }
  0xd2   :  { %v90_v55 = vpop.trf.xlu0 }
  0xd3   :  { %v141_v56 = vmax.f32 %v139_v52, %v140_v54  ;;  %vm128_vm8 = vcmp.lt.s32.totalorder %v126_v53, %v127_v57 }
  0xd4   :  { %v129_v5 = vsel %vm128_vm8, %v126_v53, %v127_v57 }
  0xd5   :  { %v142_v58 = vrot.slane %v141_v56, 1  ;;  %v130_v11 = vrot.slane %v129_v5, 1 }
  0xd6   :  { %v91_v59 = vpop.trf.xlu0 }
  0xd7   :  { %v143_v60 = vmax.f32 %v141_v56, %v142_v58  ;;  %v170_v61 = vmax.f32 %v90_v55, %v91_v59  ;;  %vm131_vm1 = vcmp.lt.s32.totalorder %v129_v5, %v130_v11 }
  0xd8   :  { %v132_v20 = vsel %vm131_vm1, %v129_v5, %v130_v11  ;;  %v239_v5 = vand.u32 127, %v96_v25 }
  0xd9   :  { %vm144_vm9 = vcmp.eq.f32.partialorder %v84_v23, %v143_v60  ;;  %vm145_vm10 = vcmp.eq.f32.partialorder %v85_v27, %v143_v60  ;;  %vm146_vm11 = vcmp.eq.f32.partialorder %v86_v31, %v143_v60  ;;  %vm147_vm12 = vcmp.eq.f32.partialorder %v87_v37, %v143_v60 }
  0xda   :  { %v148_v63 = vsel %vm144_vm9, %v444_v29, 32  ;;  %v149_v0 = vsel %vm145_vm10, %v447_v33, 32  ;;  %v150_v1 = vsel %vm146_vm11, %v450_v34, 32  ;;  %v151_v2 = vsel %vm147_vm12, %v453_v35, 32  ;;  %v466_v3 = vpop.trf.xlu0 }
  0xdb   :  { %vm152_vm13 = vcmp.lt.s32.totalorder %v148_v63, %v149_v0  ;;  %vm154_vm14 = vcmp.lt.s32.totalorder %v150_v1, %v151_v2  ;;  %v171_v4 = vmax.f32 %v169_v62, %v170_v61  ;;  %vm133_vm3 = vcmp.lt.s32.totalorder %v132_v20, 31 }
  0xdc   :  { %v153_v6 = vsel %vm152_vm13, %v148_v63, %v149_v0  ;;  %v155_v7 = vsel %vm154_vm14, %v150_v1, %v151_v2  ;;  %v478_v41 = vsel %vm133_vm3, %v132_v20, 31 }
  0xdd   :  { %vm156_vm15 = vcmp.lt.s32.totalorder %v153_v6, %v155_v7  ;;  %v172_v8 = vrot.slane %v171_v4, 4 }
  0xde   :  { %v157_v9 = vsel %vm156_vm15, %v153_v6, %v155_v7  ;;  %v468_v10 = vpop.trf.xlu0 }
  0xdf   :  { %v158_v12 = vrot.slane %v157_v9, 4  ;;  %v173_v13 = vmax.f32 %v171_v4, %v172_v8  ;;  %v203_v27 = vmax.f32 %v466_v3, %v468_v10 }
  0xe1   :  { %vm159_vm0 = vcmp.lt.s32.totalorder %v157_v9, %v158_v12  ;;  %v174_v14 = vrot.slane %v173_v13, 2 }
  0xe2   :  { %v160_v15 = vsel %vm159_vm0, %v157_v9, %v158_v12  ;;  %v94_v16 = vpop.trf.xlu0 }
  0xe3   :  { %v161_v17 = vrot.slane %v160_v15, 2  ;;  %v175_v18 = vmax.f32 %v173_v13, %v174_v14 }
  0xe5   :  { %vm162_vm2 = vcmp.lt.s32.totalorder %v160_v15, %v161_v17  ;;  %v176_v19 = vrot.slane %v175_v18, 1 }
  0xe6   :  { %v163_v21 = vsel %vm162_vm2, %v160_v15, %v161_v17  ;;  %v95_v22 = vpop.trf.xlu0 }
  0xe7   :  { %v164_v23 = vrot.slane %v163_v21, 1  ;;  %v177_v24 = vmax.f32 %v175_v18, %v176_v19  ;;  %v204_v26 = vmax.f32 %v94_v16, %v95_v22 }
  0xe9   :  { %vm165_vm4 = vcmp.lt.s32.totalorder %v163_v21, %v164_v23  ;;  %vm178_vm5 = vcmp.eq.f32.partialorder %v459_v46, %v177_v24  ;;  %vm179_vm6 = vcmp.eq.f32.partialorder %v89_v51, %v177_v24  ;;  %vm180_vm7 = vcmp.eq.f32.partialorder %v90_v55, %v177_v24 }
  0xea   :  { %v166_v28 = vsel %vm165_vm4, %v163_v21, %v164_v23  ;;  %vm181_vm8 = vcmp.eq.f32.partialorder %v91_v59, %v177_v24  ;;  %v182_v30 = vsel %vm178_vm5, %v444_v29, 32  ;;  %v183_v31 = vsel %vm179_vm6, %v447_v33, 32 }
  0xeb   :  { %v184_v32 = vsel %vm180_vm7, %v450_v34, 32  ;;  %v185_v36 = vsel %vm181_vm8, %v453_v35, 32  ;;  %vm186_vm9 = vcmp.lt.s32.totalorder %v182_v30, %v183_v31  ;;  %v205_v37 = vmax.f32 %v203_v27, %v204_v26 }
  0xec   :  { %v187_v38 = vsel %vm186_vm9, %v182_v30, %v183_v31  ;;  %vm188_vm10 = vcmp.lt.s32.totalorder %v184_v32, %v185_v36  ;;  %vm167_vm11 = vcmp.lt.s32.totalorder %v166_v28, 31 }
  0xed   :  { %v189_v39 = vsel %vm188_vm10, %v184_v32, %v185_v36  ;;  %v206_v40 = vrot.slane %v205_v37, 4  ;;  %v168_v42 = vsel %vm167_vm11, %v166_v28, 31 }
  0xee   :  { %vm190_vm12 = vcmp.lt.s32.totalorder %v187_v38, %v189_v39  ;;  %vm283_vm13 = vcmp.ne.s32.totalorder %v168_v42, %v478_v41  ;;  %vm284_vm14 = vcmp.ne.s32.totalorder %v168_v42, 0 }
  0xef   :  { %v191_v43 = vsel %vm190_vm12, %v187_v38, %v189_v39  ;;  %v207_v44 = vmax.f32 %v205_v37, %v206_v40  ;;  %vm285_vm15 = vmand %vm283_vm13, %vm284_vm14 }
  0xf0   :  { %v192_v45 = vrot.slane %v191_v43, 4  ;;  %v286_v46 = vsel %vm285_vm15, %v168_v42, 4294967295 }
  0xf1   :  { %v208_v47 = vrot.slane %v207_v44, 2  ;;  %287 = vst [vmem:[#allocation7 + $0x1] sm:$0x1] %v286_v46 }
  0xf2   :  { %vm193_vm0 = vcmp.lt.s32.totalorder %v191_v43, %v192_v45 }
  0xf3   :  { %v194_v48 = vsel %vm193_vm0, %v191_v43, %v192_v45  ;;  %v209_v49 = vmax.f32 %v207_v44, %v208_v47 }
  0xf4   :  { %v195_v50 = vrot.slane %v194_v48, 2 }
  0xf5   :  { %v210_v51 = vrot.slane %v209_v49, 1 }
  0xf6   :  { %vm196_vm1 = vcmp.lt.s32.totalorder %v194_v48, %v195_v50 }
  0xf7   :  { %v197_v52 = vsel %vm196_vm1, %v194_v48, %v195_v50  ;;  %v211_v53 = vmax.f32 %v209_v49, %v210_v51 }
  0xf8   :  { %v198_v54 = vrot.slane %v197_v52, 1 }
  0xf9   :  { %vm212_vm2 = vcmp.eq.f32.partialorder %v466_v3, %v211_v53  ;;  %vm213_vm3 = vcmp.eq.f32.partialorder %v468_v10, %v211_v53  ;;  %vm214_vm4 = vcmp.eq.f32.partialorder %v94_v16, %v211_v53  ;;  %vm215_vm5 = vcmp.eq.f32.partialorder %v95_v22, %v211_v53 }
  0xfa   :  { %vm199_vm6 = vcmp.lt.s32.totalorder %v197_v52, %v198_v54  ;;  %v216_v55 = vsel %vm212_vm2, %v444_v29, 32  ;;  %v217_v56 = vsel %vm213_vm3, %v447_v33, 32  ;;  %v218_v57 = vsel %vm214_vm4, %v450_v34, 32 }
  0xfb   :  { %v219_v58 = vsel %vm215_vm5, %v453_v35, 32  ;;  %vm220_vm7 = vcmp.lt.s32.totalorder %v216_v55, %v217_v56  ;;  %v200_v59 = vsel %vm199_vm6, %v197_v52, %v198_v54  ;;  %vm276_vm5 = vcmp.eq.s32.totalorder %v239_v5, 0 }
  0xfc   :  { %v221_v60 = vsel %vm220_vm7, %v216_v55, %v217_v56  ;;  %vm222_vm8 = vcmp.lt.s32.totalorder %v218_v57, %v219_v58  ;;  %vm201_vm9 = vcmp.lt.s32.totalorder %v200_v59, 31  ;;  %vm279_vm6 = vcmp.ne.s32.totalorder %v478_v41, 0 }
  0xfd   :  { %v223_v61 = vsel %vm222_vm8, %v218_v57, %v219_v58  ;;  %v202_v62 = vsel %vm201_vm9, %v200_v59, 31 }
  0xfe   :  { %vm224_vm10 = vcmp.lt.s32.totalorder %v221_v60, %v223_v61  ;;  %vm288_vm11 = vcmp.ne.s32.totalorder %v202_v62, %v168_v42  ;;  %vm289_vm12 = vcmp.ne.s32.totalorder %v202_v62, 0 }
  0xff   :  { %v225_v63 = vsel %vm224_vm10, %v221_v60, %v223_v61  ;;  %vm290_vm13 = vmand %vm288_vm11, %vm289_vm12 }
 0x100   :  { %v226_v0 = vrot.slane %v225_v63, 4  ;;  %v291_v29 = vsel %vm290_vm13, %v202_v62, 4294967295 }
 0x101   :  { %292 = vst [vmem:[#allocation7 + $0x2] sm:$0x1] %v291_v29 }
 0x102   :  { %vm227_vm14 = vcmp.lt.s32.totalorder %v225_v63, %v226_v0 }
 0x103   :  { %v228_v33 = vsel %vm227_vm14, %v225_v63, %v226_v0 }
 0x104   :  { %v229_v34 = vrot.slane %v228_v33, 2 }
 0x106   :  { %vm230_vm15 = vcmp.lt.s32.totalorder %v228_v33, %v229_v34 }
 0x107   :  { %v231_v35 = vsel %vm230_vm15, %v228_v33, %v229_v34 }
 0x108   :  { %v232_v1 = vrot.slane %v231_v35, 1 }
 0x10a   :  { %vm233_vm0 = vcmp.lt.s32.totalorder %v231_v35, %v232_v1 }
 0x10b   :  { %v234_v2 = vsel %vm233_vm0, %v231_v35, %v232_v1 }
 0x10c   :  { %vm235_vm1 = vcmp.lt.s32.totalorder %v234_v2, 31 }
 0x10d   :  { %v236_v3 = vsel %vm235_vm1, %v234_v2, 31 }
 0x10e   :  { %274 = vrot.lane.b32.xlu1 %v236_v3, %s399_s1  ;;  %vm293_vm2 = vcmp.ne.s32.totalorder %v236_v3, %v202_v62  ;;  %vm294_vm3 = vcmp.ne.s32.totalorder %v236_v3, 0 }
 0x10f   :  { %vm295_vm4 = vmand %vm293_vm2, %vm294_vm3 }
 0x110   :  { %v296_v4 = vsel %vm295_vm4, %v236_v3, 4294967295 }
 0x111   :  { %297 = vst [vmem:[#allocation7 + $0x3] sm:$0x1] %v296_v4 }
 0x180   :  { %v275_v6 = vpop.permute.xlu1 %274 }
 0x181   :  { %v277_v7 = vsel %vm276_vm5, 4294967295, %v275_v6 }
 0x182   :  { %vm278_vm7 = vcmp.ne.s32.totalorder %v478_v41, %v277_v7 }
 0x183   :  { %vm280_vm8 = vmand %vm278_vm7, %vm279_vm6 }
 0x184   :  { %v281_v8 = vsel %vm280_vm8, %v478_v41, 4294967295 }
 0x185   :  { %282 = vst [vmem:[#allocation7] sm:$0x1] %v281_v8 }
 0x186   :  { %378 = shalt.err (!%p375_p8)
}
 0x187   :  { %s379_s14 = scalar_lea.hbm %s505_s2, 64 }
 0x188   :  { %p380_p9 = scmp.ne.s32.totalorder %s505_s2, %s379_s14  ;;  %p383_p10 = scmp.lt.u32.totalorder %s379_s14, %s505_s2 }
 0x18a   :  { %p385_p11 = pnand %p383_p10, %p380_p9 }
 0x18c   :  { %388 = shalt.err (!%p385_p11)
}
 0x18d   :  { %307 = dma.vmem_to_hbm [thread:$0]  %s305_s10, 64, %s505_s2, [#allocation4]  }
 0x18e   :  { %393 = dma.done.wait [#allocation4], 64  }
 0x18f   :  { %394 = vsyncadd [#allocation4], 4294967232 }
 0x190   :  { %311 = vsyncpa [#allocation3], 1 }
 0x191   :  { %312 = vsyncpa [#allocation6], 1 }
 0x192   :  { %313 = vsyncpa [#allocation4], 1 }

</bundles_post_ra>
